<compile_context>
chip_gen: v6e
topology: v6e:2x2x1
jax: 0.10.0
libtpu: 0.0.40
codegen_flags: <defaults>
</compile_context>

<pallas_src>
import functools

import jax
import jax.numpy as jnp
from jax.experimental import pallas as pl
from jax.experimental.pallas import tpu as pltpu


def _round_up(x, m):
    return ((x + m - 1) // m) * m


# ----------------------------------------------------------------------------
# Pallas kernel: fused frame-stacking MLP
#   x   = [obs_flat , one_hot(actions)]            (one-hot folded in-kernel)
#   h1  = tanh(x @ W1 + b1)
#   h2  = tanh(h1 @ W2 + b2)
#   y   = h2 @ [Wo | Wv | 0-pad] + [bo | bv | 0]   (fused heads, 128-lane-dense)
# ----------------------------------------------------------------------------
def frame_stack_mlp_kernel(obs_ref, act_ref, w1o_ref, w1a_ref, b1_ref,
                           w2_ref, b2_ref, wh_ref, bh_ref, out_ref,
                           *, num_frames, n_actions):
    obs = obs_ref[...]                      # [TB, F*obs_dim] f32
    act = act_ref[...]                      # [TB, F] int32
    tb = obs.shape[0]
    hidden = b1_ref.shape[-1]
    mm_dtype = w1o_ref.dtype                # f32 or bf16 (MXU operand dtype)

    # Action contribution: one_hot(actions) @ W1_act computed as an exact
    # masked row-select/sum on the VPU (no extra MXU pass, pure f32 -> v5e safe).
    w1a = w1a_ref[...].astype(jnp.float32)  # [F*A, hidden], tiny
    act_contrib = jnp.zeros((tb, hidden), jnp.float32)
    for f in range(num_frames):             # static unroll (F*A = 12 terms)
        sel = act[:, f:f + 1]               # [TB, 1] int32
        for a in range(n_actions):
            row = f * n_actions + a
            mask = (sel == a).astype(jnp.float32)            # [TB, 1]
            act_contrib = act_contrib + mask * w1a[row:row + 1, :]

    h1 = jnp.tanh(
        jnp.dot(obs.astype(mm_dtype), w1o_ref[...],
                preferred_element_type=jnp.float32)
        + act_contrib + b1_ref[...])
    h2 = jnp.tanh(
        jnp.dot(h1.astype(mm_dtype), w2_ref[...],
                preferred_element_type=jnp.float32)
        + b2_ref[...])
    # Fused policy + value heads, single lane-dense (TB, 128) store.
    out_ref[...] = (
        jnp.dot(h2.astype(mm_dtype), wh_ref[...],
                preferred_element_type=jnp.float32)
        + bh_ref[...])


# ----------------------------------------------------------------------------
# Host-side parameter preparation (split W1, fuse + pad the heads).
# ----------------------------------------------------------------------------
def prepare_kernel_params(params, num_frames, obs_dim, n_actions,
                          matmul_dtype=jnp.float32):
    w1, b1, w2, b2, wo, bo, wv, bv = params
    obs_in = num_frames * obs_dim
    w1_obs = w1[:obs_in].astype(matmul_dtype)
    w1_act = w1[obs_in:].astype(jnp.float32)       # VPU select path stays f32
    w_heads = jnp.concatenate([wo, wv], axis=1)    # [hidden, num_outputs + 1]
    b_heads = jnp.concatenate([bo, bv], axis=1)
    n_heads = w_heads.shape[1]
    head_w = _round_up(n_heads, 128)               # lane-dense output width
    pad = head_w - n_heads
    w_heads = jnp.pad(w_heads, ((0, 0), (0, pad))).astype(matmul_dtype)
    b_heads = jnp.pad(b_heads, ((0, 0), (0, pad))).astype(jnp.float32)
    return (w1_obs, w1_act, b1.astype(jnp.float32), w2.astype(matmul_dtype),
            b2.astype(jnp.float32), w_heads, b_heads), n_heads


def frame_stacking_forward(prev_n_obs, prev_n_actions, params, n_actions,
                           matmul_dtype=jnp.float32):
    """JAX/Pallas equivalent of TorchFrameStackingModel.forward.

    Returns (logits [B, num_outputs], value [B]) where value == value_function().
    """
    B, num_frames, obs_dim = prev_n_obs.shape
    obs_in = num_frames * obs_dim
    kparams, n_heads = prepare_kernel_params(params, num_frames, obs_dim,
                                             n_actions, matmul_dtype)
    w1_obs, w1_act, b1, w2, b2, w_heads, b_heads = kparams
    hidden = w2.shape[0]
    head_w = w_heads.shape[1]
    num_outputs = n_heads - 1

    # Batch tiling: sublane-aligned tile; grid axis is 'parallel' so v7x's two
    # TensorCores split a large batch. At toy sizes this is a single grid step.
    TB = 128 if B >= 128 else _round_up(B, 8)
    B_pad = _round_up(B, TB)

    obs_flat = jnp.reshape(prev_n_obs, (B, obs_in)).astype(jnp.float32)
    acts = prev_n_actions.astype(jnp.int32)
    if B_pad != B:
        obs_flat = jnp.pad(obs_flat, ((0, B_pad - B), (0, 0)))
        acts = jnp.pad(acts, ((0, B_pad - B), (0, 0)))

    flops = 2 * B_pad * (obs_in * hidden + hidden * hidden + hidden * head_w)
    transcendentals = 2 * B_pad * hidden
    bytes_accessed = int(
        obs_flat.size * 4 + acts.size * 4 + B_pad * head_w * 4
        + sum(int(w.size) * w.dtype.itemsize
              for w in (w1_obs, w1_act, b1, w2, b2, w_heads, b_heads)))

    kernel = functools.partial(frame_stack_mlp_kernel,
                               num_frames=num_frames, n_actions=n_actions)

    y = pl.pallas_call(
        kernel,
        out_shape=jax.ShapeDtypeStruct((B_pad, head_w), jnp.float32),
        grid=(B_pad // TB,),
        in_specs=[
            pl.BlockSpec((TB, obs_in), lambda i: (i, 0)),           # obs tile
            pl.BlockSpec((TB, num_frames), lambda i: (i, 0)),       # actions tile
            pl.BlockSpec((obs_in, hidden), lambda i: (0, 0)),       # W1_obs (resident)
            pl.BlockSpec((num_frames * n_actions, hidden), lambda i: (0, 0)),  # W1_act
            pl.BlockSpec((1, hidden), lambda i: (0, 0)),            # b1
            pl.BlockSpec((hidden, hidden), lambda i: (0, 0)),       # W2
            pl.BlockSpec((1, hidden), lambda i: (0, 0)),            # b2
            pl.BlockSpec((hidden, head_w), lambda i: (0, 0)),       # fused heads W
            pl.BlockSpec((1, head_w), lambda i: (0, 0)),            # fused heads b
        ],
        out_specs=pl.BlockSpec((TB, head_w), lambda i: (i, 0)),
        compiler_params=pltpu.CompilerParams(
            dimension_semantics=("parallel",)),
        cost_estimate=pl.CostEstimate(
            flops=flops, transcendentals=transcendentals,
            bytes_accessed=bytes_accessed),
    )(obs_flat, acts, w1_obs, w1_act, b1, w2, b2, w_heads, b_heads)

    logits = y[:B, :num_outputs]
    value = y[:B, num_outputs]          # == torch.squeeze(values(features), -1)
    return logits, value


# ----------------------------------------------------------------------------
# Synthetic init + pure-JAX reference (literal translation of the torch forward)
# ----------------------------------------------------------------------------
def init_params(key, in_size, hidden, num_outputs):
    ks = jax.random.split(key, 8)

    def dense(kw, kb, fan_in, fan_out):
        scale = 1.0 / jnp.sqrt(jnp.float32(fan_in))
        w = jax.random.uniform(kw, (fan_in, fan_out), jnp.float32, -scale, scale)
        b = jax.random.uniform(kb, (1, fan_out), jnp.float32, -scale, scale)
        return w, b

    w1, b1 = dense(ks[0], ks[1], in_size, hidden)
    w2, b2 = dense(ks[2], ks[3], hidden, hidden)
    wo, bo = dense(ks[4], ks[5], hidden, num_outputs)
    wv, bv = dense(ks[6], ks[7], hidden, 1)
    return (w1, b1, w2, b2, wo, bo, wv, bv)


def reference_forward(prev_n_obs, prev_n_actions, params, n_actions):
    B, num_frames, obs_dim = prev_n_obs.shape
    obs_flat = jnp.reshape(prev_n_obs, (B, num_frames * obs_dim))
    act_onehot = jax.nn.one_hot(prev_n_actions, n_actions, dtype=jnp.float32)
    act_flat = jnp.reshape(act_onehot, (B, num_frames * n_actions))
    x = jnp.concatenate([obs_flat, act_flat], axis=-1)
    w1, b1, w2, b2, wo, bo, wv, bv = params
    h1 = jnp.tanh(x @ w1 + b1)
    h2 = jnp.tanh(h1 @ w2 + b2)
    return h2 @ wo + bo, jnp.squeeze(h2 @ wv + bv, -1)


if __name__ == "__main__":
    # Small shapes consistent with the module's forward.
    B = 8            # batch
    num_frames = 3   # model default
    obs_dim = 16     # obs_space.shape[0]
    n_actions = 4    # action_space.n
    hidden = 256     # SlimFC hidden size
    num_outputs = n_actions
    in_size = num_frames * (obs_dim + n_actions)   # 60

    key = jax.random.PRNGKey(0)
    k_obs, k_act, k_par = jax.random.split(key, 3)
    prev_n_obs = jax.random.normal(k_obs, (B, num_frames, obs_dim), jnp.float32)
    prev_n_actions = jax.random.randint(k_act, (B, num_frames), 0, n_actions,
                                        jnp.int32)
    params = init_params(k_par, in_size, hidden, num_outputs)

    ref_logits, ref_value = reference_forward(prev_n_obs, prev_n_actions,
                                              params, n_actions)

    # f32 MXU operands (v5e-safe default).  Tolerance accounts for TPU's
    # default reduced-precision f32 matmul + the restructured (exact) action path.
    logits, value = frame_stacking_forward(prev_n_obs, prev_n_actions, params,
                                           n_actions, matmul_dtype=jnp.float32)
    logits = jax.block_until_ready(logits)
    value = jax.block_until_ready(value)
    assert logits.shape == (B, num_outputs)
    assert value.shape == (B,)
    assert jnp.allclose(logits, ref_logits, atol=1e-2, rtol=1e-2)
    assert jnp.allclose(value, ref_value, atol=1e-2, rtol=1e-2)

    # bf16 MXU operands (v6e/v7x fast path), f32 accumulation / bias / tanh.
    logits_bf, value_bf = frame_stacking_forward(prev_n_obs, prev_n_actions,
                                                 params, n_actions,
                                                 matmul_dtype=jnp.bfloat16)
    logits_bf = jax.block_until_ready(logits_bf)
    value_bf = jax.block_until_ready(value_bf)
    assert jnp.allclose(logits_bf, ref_logits, atol=3e-2, rtol=3e-2)
    assert jnp.allclose(value_bf, ref_value, atol=3e-2, rtol=3e-2)

    # TODO(synk): RLlib ViewRequirement buffering / _last_value caching are
    # framework plumbing; the value head is returned alongside the logits instead.
    print("KERNEL_OK")
</pallas_src>

<mosaic_0001>
module attributes {stable_mosaic.version = 11 : i64} {
  func.func @frame_stack_mlp_kernel(%arg0: i32, %arg1: memref<8x48xf32, #tpu.memory_space<vmem>>, %arg2: memref<8x3xi32, #tpu.memory_space<vmem>>, %arg3: memref<48x256xf32, #tpu.memory_space<vmem>>, %arg4: memref<12x256xf32, #tpu.memory_space<vmem>>, %arg5: memref<1x256xf32, #tpu.memory_space<vmem>>, %arg6: memref<256x256xf32, #tpu.memory_space<vmem>>, %arg7: memref<1x256xf32, #tpu.memory_space<vmem>>, %arg8: memref<256x128xf32, #tpu.memory_space<vmem>>, %arg9: memref<1x128xf32, #tpu.memory_space<vmem>>, %arg10: memref<8x128xf32, #tpu.memory_space<vmem>>) attributes {dimension_semantics = [#tpu.dimension_semantics<parallel>], iteration_bounds = array<i64: 1>, scalar_prefetch = 0 : i64, scratch_operands = 0 : i64, tpu.core_type = #tpu.core_type<tc>, window_params = [{transform_indices = @transform_0, window_bounds = array<i64: 8, 48>}, {transform_indices = @transform_1, window_bounds = array<i64: 8, 3>}, {pipeline_mode = #tpu.pipeline_mode<synchronous>, transform_indices = @transform_2, window_bounds = array<i64: 48, 256>}, {pipeline_mode = #tpu.pipeline_mode<synchronous>, transform_indices = @transform_3, window_bounds = array<i64: 12, 256>}, {pipeline_mode = #tpu.pipeline_mode<synchronous>, transform_indices = @transform_4, window_bounds = array<i64: 1, 256>}, {pipeline_mode = #tpu.pipeline_mode<synchronous>, transform_indices = @transform_5, window_bounds = array<i64: 256, 256>}, {pipeline_mode = #tpu.pipeline_mode<synchronous>, transform_indices = @transform_6, window_bounds = array<i64: 1, 256>}, {pipeline_mode = #tpu.pipeline_mode<synchronous>, transform_indices = @transform_7, window_bounds = array<i64: 256, 128>}, {pipeline_mode = #tpu.pipeline_mode<synchronous>, transform_indices = @transform_8, window_bounds = array<i64: 1, 128>}, {transform_indices = @transform_9, window_bounds = array<i64: 8, 128>}]} {
    %c0 = arith.constant 0 : index
    %c0_0 = arith.constant 0 : index
    %0 = vector.load %arg1[%c0, %c0_0] : memref<8x48xf32, #tpu.memory_space<vmem>>, vector<8x48xf32>
    %c0_1 = arith.constant 0 : index
    %c0_2 = arith.constant 0 : index
    %1 = vector.load %arg2[%c0_1, %c0_2] : memref<8x3xi32, #tpu.memory_space<vmem>>, vector<8x3xi32>
    %c0_3 = arith.constant 0 : index
    %c0_4 = arith.constant 0 : index
    %2 = vector.load %arg4[%c0_3, %c0_4] : memref<12x256xf32, #tpu.memory_space<vmem>>, vector<12x256xf32>
    %cst = arith.constant 0.000000e+00 : f32
    %3 = vector.broadcast %cst : f32 to vector<8x256xf32>
    %4 = vector.extract_strided_slice %1 {offsets = [0, 0], sizes = [8, 1], strides = [1, 1]} : vector<8x3xi32> to vector<8x1xi32>
    %c0_i32 = arith.constant 0 : i32
    %5 = vector.broadcast %c0_i32 : i32 to vector<8x1xi32>
    %6 = arith.cmpi eq, %4, %5 : vector<8x1xi32>
    %7 = arith.extui %6 : vector<8x1xi1> to vector<8x1xi32>
    %8 = arith.sitofp %7 : vector<8x1xi32> to vector<8x1xf32>
    %9 = vector.extract_strided_slice %2 {offsets = [0, 0], sizes = [1, 256], strides = [1, 1]} : vector<12x256xf32> to vector<1x256xf32>
    %10 = vector.broadcast %8 : vector<8x1xf32> to vector<8x256xf32>
    %11 = vector.broadcast %9 : vector<1x256xf32> to vector<8x256xf32>
    %12 = arith.mulf %10, %11 : vector<8x256xf32>
    %13 = arith.addf %3, %12 : vector<8x256xf32>
    %c1_i32 = arith.constant 1 : i32
    %14 = vector.broadcast %c1_i32 : i32 to vector<8x1xi32>
    %15 = arith.cmpi eq, %4, %14 : vector<8x1xi32>
    %16 = arith.extui %15 : vector<8x1xi1> to vector<8x1xi32>
    %17 = arith.sitofp %16 : vector<8x1xi32> to vector<8x1xf32>
    %18 = vector.extract_strided_slice %2 {offsets = [1, 0], sizes = [1, 256], strides = [1, 1]} : vector<12x256xf32> to vector<1x256xf32>
    %19 = vector.broadcast %17 : vector<8x1xf32> to vector<8x256xf32>
    %20 = vector.broadcast %18 : vector<1x256xf32> to vector<8x256xf32>
    %21 = arith.mulf %19, %20 : vector<8x256xf32>
    %22 = arith.addf %13, %21 : vector<8x256xf32>
    %c2_i32 = arith.constant 2 : i32
    %23 = vector.broadcast %c2_i32 : i32 to vector<8x1xi32>
    %24 = arith.cmpi eq, %4, %23 : vector<8x1xi32>
    %25 = arith.extui %24 : vector<8x1xi1> to vector<8x1xi32>
    %26 = arith.sitofp %25 : vector<8x1xi32> to vector<8x1xf32>
    %27 = vector.extract_strided_slice %2 {offsets = [2, 0], sizes = [1, 256], strides = [1, 1]} : vector<12x256xf32> to vector<1x256xf32>
    %28 = vector.broadcast %26 : vector<8x1xf32> to vector<8x256xf32>
    %29 = vector.broadcast %27 : vector<1x256xf32> to vector<8x256xf32>
    %30 = arith.mulf %28, %29 : vector<8x256xf32>
    %31 = arith.addf %22, %30 : vector<8x256xf32>
    %c3_i32 = arith.constant 3 : i32
    %32 = vector.broadcast %c3_i32 : i32 to vector<8x1xi32>
    %33 = arith.cmpi eq, %4, %32 : vector<8x1xi32>
    %34 = arith.extui %33 : vector<8x1xi1> to vector<8x1xi32>
    %35 = arith.sitofp %34 : vector<8x1xi32> to vector<8x1xf32>
    %36 = vector.extract_strided_slice %2 {offsets = [3, 0], sizes = [1, 256], strides = [1, 1]} : vector<12x256xf32> to vector<1x256xf32>
    %37 = vector.broadcast %35 : vector<8x1xf32> to vector<8x256xf32>
    %38 = vector.broadcast %36 : vector<1x256xf32> to vector<8x256xf32>
    %39 = arith.mulf %37, %38 : vector<8x256xf32>
    %40 = arith.addf %31, %39 : vector<8x256xf32>
    %41 = vector.extract_strided_slice %1 {offsets = [0, 1], sizes = [8, 1], strides = [1, 1]} : vector<8x3xi32> to vector<8x1xi32>
    %c0_i32_5 = arith.constant 0 : i32
    %42 = vector.broadcast %c0_i32_5 : i32 to vector<8x1xi32>
    %43 = arith.cmpi eq, %41, %42 : vector<8x1xi32>
    %44 = arith.extui %43 : vector<8x1xi1> to vector<8x1xi32>
    %45 = arith.sitofp %44 : vector<8x1xi32> to vector<8x1xf32>
    %46 = vector.extract_strided_slice %2 {offsets = [4, 0], sizes = [1, 256], strides = [1, 1]} : vector<12x256xf32> to vector<1x256xf32>
    %47 = vector.broadcast %45 : vector<8x1xf32> to vector<8x256xf32>
    %48 = vector.broadcast %46 : vector<1x256xf32> to vector<8x256xf32>
    %49 = arith.mulf %47, %48 : vector<8x256xf32>
    %50 = arith.addf %40, %49 : vector<8x256xf32>
    %c1_i32_6 = arith.constant 1 : i32
    %51 = vector.broadcast %c1_i32_6 : i32 to vector<8x1xi32>
    %52 = arith.cmpi eq, %41, %51 : vector<8x1xi32>
    %53 = arith.extui %52 : vector<8x1xi1> to vector<8x1xi32>
    %54 = arith.sitofp %53 : vector<8x1xi32> to vector<8x1xf32>
    %55 = vector.extract_strided_slice %2 {offsets = [5, 0], sizes = [1, 256], strides = [1, 1]} : vector<12x256xf32> to vector<1x256xf32>
    %56 = vector.broadcast %54 : vector<8x1xf32> to vector<8x256xf32>
    %57 = vector.broadcast %55 : vector<1x256xf32> to vector<8x256xf32>
    %58 = arith.mulf %56, %57 : vector<8x256xf32>
    %59 = arith.addf %50, %58 : vector<8x256xf32>
    %c2_i32_7 = arith.constant 2 : i32
    %60 = vector.broadcast %c2_i32_7 : i32 to vector<8x1xi32>
    %61 = arith.cmpi eq, %41, %60 : vector<8x1xi32>
    %62 = arith.extui %61 : vector<8x1xi1> to vector<8x1xi32>
    %63 = arith.sitofp %62 : vector<8x1xi32> to vector<8x1xf32>
    %64 = vector.extract_strided_slice %2 {offsets = [6, 0], sizes = [1, 256], strides = [1, 1]} : vector<12x256xf32> to vector<1x256xf32>
    %65 = vector.broadcast %63 : vector<8x1xf32> to vector<8x256xf32>
    %66 = vector.broadcast %64 : vector<1x256xf32> to vector<8x256xf32>
    %67 = arith.mulf %65, %66 : vector<8x256xf32>
    %68 = arith.addf %59, %67 : vector<8x256xf32>
    %c3_i32_8 = arith.constant 3 : i32
    %69 = vector.broadcast %c3_i32_8 : i32 to vector<8x1xi32>
    %70 = arith.cmpi eq, %41, %69 : vector<8x1xi32>
    %71 = arith.extui %70 : vector<8x1xi1> to vector<8x1xi32>
    %72 = arith.sitofp %71 : vector<8x1xi32> to vector<8x1xf32>
    %73 = vector.extract_strided_slice %2 {offsets = [7, 0], sizes = [1, 256], strides = [1, 1]} : vector<12x256xf32> to vector<1x256xf32>
    %74 = vector.broadcast %72 : vector<8x1xf32> to vector<8x256xf32>
    %75 = vector.broadcast %73 : vector<1x256xf32> to vector<8x256xf32>
    %76 = arith.mulf %74, %75 : vector<8x256xf32>
    %77 = arith.addf %68, %76 : vector<8x256xf32>
    %78 = vector.extract_strided_slice %1 {offsets = [0, 2], sizes = [8, 1], strides = [1, 1]} : vector<8x3xi32> to vector<8x1xi32>
    %c0_i32_9 = arith.constant 0 : i32
    %79 = vector.broadcast %c0_i32_9 : i32 to vector<8x1xi32>
    %80 = arith.cmpi eq, %78, %79 : vector<8x1xi32>
    %81 = arith.extui %80 : vector<8x1xi1> to vector<8x1xi32>
    %82 = arith.sitofp %81 : vector<8x1xi32> to vector<8x1xf32>
    %83 = vector.extract_strided_slice %2 {offsets = [8, 0], sizes = [1, 256], strides = [1, 1]} : vector<12x256xf32> to vector<1x256xf32>
    %84 = vector.broadcast %82 : vector<8x1xf32> to vector<8x256xf32>
    %85 = vector.broadcast %83 : vector<1x256xf32> to vector<8x256xf32>
    %86 = arith.mulf %84, %85 : vector<8x256xf32>
    %87 = arith.addf %77, %86 : vector<8x256xf32>
    %c1_i32_10 = arith.constant 1 : i32
    %88 = vector.broadcast %c1_i32_10 : i32 to vector<8x1xi32>
    %89 = arith.cmpi eq, %78, %88 : vector<8x1xi32>
    %90 = arith.extui %89 : vector<8x1xi1> to vector<8x1xi32>
    %91 = arith.sitofp %90 : vector<8x1xi32> to vector<8x1xf32>
    %92 = vector.extract_strided_slice %2 {offsets = [9, 0], sizes = [1, 256], strides = [1, 1]} : vector<12x256xf32> to vector<1x256xf32>
    %93 = vector.broadcast %91 : vector<8x1xf32> to vector<8x256xf32>
    %94 = vector.broadcast %92 : vector<1x256xf32> to vector<8x256xf32>
    %95 = arith.mulf %93, %94 : vector<8x256xf32>
    %96 = arith.addf %87, %95 : vector<8x256xf32>
    %c2_i32_11 = arith.constant 2 : i32
    %97 = vector.broadcast %c2_i32_11 : i32 to vector<8x1xi32>
    %98 = arith.cmpi eq, %78, %97 : vector<8x1xi32>
    %99 = arith.extui %98 : vector<8x1xi1> to vector<8x1xi32>
    %100 = arith.sitofp %99 : vector<8x1xi32> to vector<8x1xf32>
    %101 = vector.extract_strided_slice %2 {offsets = [10, 0], sizes = [1, 256], strides = [1, 1]} : vector<12x256xf32> to vector<1x256xf32>
    %102 = vector.broadcast %100 : vector<8x1xf32> to vector<8x256xf32>
    %103 = vector.broadcast %101 : vector<1x256xf32> to vector<8x256xf32>
    %104 = arith.mulf %102, %103 : vector<8x256xf32>
    %105 = arith.addf %96, %104 : vector<8x256xf32>
    %c3_i32_12 = arith.constant 3 : i32
    %106 = vector.broadcast %c3_i32_12 : i32 to vector<8x1xi32>
    %107 = arith.cmpi eq, %78, %106 : vector<8x1xi32>
    %108 = arith.extui %107 : vector<8x1xi1> to vector<8x1xi32>
    %109 = arith.sitofp %108 : vector<8x1xi32> to vector<8x1xf32>
    %110 = vector.extract_strided_slice %2 {offsets = [11, 0], sizes = [1, 256], strides = [1, 1]} : vector<12x256xf32> to vector<1x256xf32>
    %111 = vector.broadcast %109 : vector<8x1xf32> to vector<8x256xf32>
    %112 = vector.broadcast %110 : vector<1x256xf32> to vector<8x256xf32>
    %113 = arith.mulf %111, %112 : vector<8x256xf32>
    %114 = arith.addf %105, %113 : vector<8x256xf32>
    %c0_13 = arith.constant 0 : index
    %c0_14 = arith.constant 0 : index
    %115 = vector.load %arg3[%c0_13, %c0_14] : memref<48x256xf32, #tpu.memory_space<vmem>>, vector<48x256xf32>
    %cst_15 = arith.constant dense<0.000000e+00> : vector<8x256xf32>
    %116 = tpu.matmul %0, %115, %cst_15 {dimension_numbers = #tpu.dot_dimension_numbers<[1], [0], [0], [1], [0, 0, 1, 1], [], []>} : vector<8x48xf32>, vector<48x256xf32>, vector<8x256xf32> -> vector<8x256xf32>
    %117 = arith.addf %116, %114 : vector<8x256xf32>
    %c0_16 = arith.constant 0 : index
    %c0_17 = arith.constant 0 : index
    %118 = vector.load %arg5[%c0_16, %c0_17] : memref<1x256xf32, #tpu.memory_space<vmem>>, vector<1x256xf32>
    %119 = vector.broadcast %118 : vector<1x256xf32> to vector<8x256xf32>
    %120 = arith.addf %117, %119 : vector<8x256xf32>
    %121 = math.tanh %120 : vector<8x256xf32>
    %c0_18 = arith.constant 0 : index
    %c0_19 = arith.constant 0 : index
    %122 = vector.load %arg6[%c0_18, %c0_19] : memref<256x256xf32, #tpu.memory_space<vmem>>, vector<256x256xf32>
    %cst_20 = arith.constant dense<0.000000e+00> : vector<8x256xf32>
    %123 = tpu.matmul %121, %122, %cst_20 {dimension_numbers = #tpu.dot_dimension_numbers<[1], [0], [0], [1], [0, 0, 1, 1], [], []>} : vector<8x256xf32>, vector<256x256xf32>, vector<8x256xf32> -> vector<8x256xf32>
    %c0_21 = arith.constant 0 : index
    %c0_22 = arith.constant 0 : index
    %124 = vector.load %arg7[%c0_21, %c0_22] : memref<1x256xf32, #tpu.memory_space<vmem>>, vector<1x256xf32>
    %125 = vector.broadcast %124 : vector<1x256xf32> to vector<8x256xf32>
    %126 = arith.addf %123, %125 : vector<8x256xf32>
    %127 = math.tanh %126 : vector<8x256xf32>
    %c0_23 = arith.constant 0 : index
    %c0_24 = arith.constant 0 : index
    %128 = vector.load %arg8[%c0_23, %c0_24] : memref<256x128xf32, #tpu.memory_space<vmem>>, vector<256x128xf32>
    %cst_25 = arith.constant dense<0.000000e+00> : vector<8x128xf32>
    %129 = tpu.matmul %127, %128, %cst_25 {dimension_numbers = #tpu.dot_dimension_numbers<[1], [0], [0], [1], [0, 0, 1, 1], [], []>} : vector<8x256xf32>, vector<256x128xf32>, vector<8x128xf32> -> vector<8x128xf32>
    %c0_26 = arith.constant 0 : index
    %c0_27 = arith.constant 0 : index
    %130 = vector.load %arg9[%c0_26, %c0_27] : memref<1x128xf32, #tpu.memory_space<vmem>>, vector<1x128xf32>
    %131 = vector.broadcast %130 : vector<1x128xf32> to vector<8x128xf32>
    %132 = arith.addf %129, %131 : vector<8x128xf32>
    %c0_28 = arith.constant 0 : index
    %c0_29 = arith.constant 0 : index
    %133 = vector.load %arg10[%c0_28, %c0_29] : memref<8x128xf32, #tpu.memory_space<vmem>>, vector<8x128xf32>
    tpu.vector_store %arg10[%c0_28, %c0_29], %132 {strides = array<i32>} : memref<8x128xf32, #tpu.memory_space<vmem>>, vector<8x128xf32>,
    return
  }
  func.func @transform_0(%arg0: i32) -> (i32, i32) {
    %c0_i32 = arith.constant 0 : i32
    %c0_i32_0 = arith.constant 0 : i32
    return %arg0, %c0_i32 : i32, i32
  }
  func.func @transform_1(%arg0: i32) -> (i32, i32) {
    %c0_i32 = arith.constant 0 : i32
    %c0_i32_0 = arith.constant 0 : i32
    return %arg0, %c0_i32 : i32, i32
  }
  func.func @transform_2(%arg0: i32) -> (i32, i32) {
    %c0_i32 = arith.constant 0 : i32
    %c0_i32_0 = arith.constant 0 : i32
    %c0_i32_1 = arith.constant 0 : i32
    return %c0_i32, %c0_i32_0 : i32, i32
  }
  func.func @transform_3(%arg0: i32) -> (i32, i32) {
    %c0_i32 = arith.constant 0 : i32
    %c0_i32_0 = arith.constant 0 : i32
    %c0_i32_1 = arith.constant 0 : i32
    return %c0_i32, %c0_i32_0 : i32, i32
  }
  func.func @transform_4(%arg0: i32) -> (i32, i32) {
    %c0_i32 = arith.constant 0 : i32
    %c0_i32_0 = arith.constant 0 : i32
    %c0_i32_1 = arith.constant 0 : i32
    return %c0_i32, %c0_i32_0 : i32, i32
  }
  func.func @transform_5(%arg0: i32) -> (i32, i32) {
    %c0_i32 = arith.constant 0 : i32
    %c0_i32_0 = arith.constant 0 : i32
    %c0_i32_1 = arith.constant 0 : i32
    return %c0_i32, %c0_i32_0 : i32, i32
  }
  func.func @transform_6(%arg0: i32) -> (i32, i32) {
    %c0_i32 = arith.constant 0 : i32
    %c0_i32_0 = arith.constant 0 : i32
    %c0_i32_1 = arith.constant 0 : i32
    return %c0_i32, %c0_i32_0 : i32, i32
  }
  func.func @transform_7(%arg0: i32) -> (i32, i32) {
    %c0_i32 = arith.constant 0 : i32
    %c0_i32_0 = arith.constant 0 : i32
    %c0_i32_1 = arith.constant 0 : i32
    return %c0_i32, %c0_i32_0 : i32, i32
  }
  func.func @transform_8(%arg0: i32) -> (i32, i32) {
    %c0_i32 = arith.constant 0 : i32
    %c0_i32_0 = arith.constant 0 : i32
    %c0_i32_1 = arith.constant 0 : i32
    return %c0_i32, %c0_i32_0 : i32, i32
  }
  func.func @transform_9(%arg0: i32) -> (i32, i32) {
    %c0_i32 = arith.constant 0 : i32
    %c0_i32_0 = arith.constant 0 : i32
    return %arg0, %c0_i32 : i32, i32
  }
}

</mosaic_0001>

<bundles_post_ra>
// kernel: tpu_custom_call.1
= control target key start
LH: loop header
LB: loop body
LE: loop exit
PB: predicated region body
PF: predicated region fallthrough
CT: control target
= control target key end

     0   :  { %14 = vsyncpa [#allocation3], 0  ;;  %s1006_s0 = inlined_call_operand.vmem [shape: f32[8,48], index: 0, kind: input, shape index: {}]   ;;  %s1007_s1 = inlined_call_operand.vmem [shape: s32[8,3], index: 1, kind: input, shape index: {}]   ;;  %s1008_s2 = inlined_call_operand.hbm [shape: f32[48,256], index: 2, kind: input, shape index: {}]   ;;  %s1009_s3 = inlined_call_operand.hbm [shape: f32[12,256], index: 3, kind: input, shape index: {}]   ;;  %s1010_s4 = inlined_call_operand.vmem [shape: f32[1,256], index: 4, kind: input, shape index: {}]   ;;  %s1011_s5 = inlined_call_operand.hbm [shape: f32[256,256], index: 5, kind: input, shape index: {}]   ;;  %s1012_s6 = inlined_call_operand.vmem [shape: f32[1,256], index: 6, kind: input, shape index: {}]   ;;  %s1013_s7 = inlined_call_operand.hbm [shape: f32[256,128], index: 7, kind: input, shape index: {}]   ;;  %s1014_s8 = inlined_call_operand.vmem [shape: f32[1,128], index: 8, kind: input, shape index: {}]   ;;  %s1015_s9 = inlined_call_operand.hbm [shape: f32[8,128], index: 9, kind: output, shape index: {}]  }
   0x1   :  { %15 = vsyncpa [#allocation6], 0 }
   0x2   :  { %16 = vsyncpa [#allocation9], 0 }
   0x3   :  { %17 = vsyncpa [#allocation4], 0  ;;  %s875_s30 = smov [#allocation5]   ;;  %s876_s11 = smov [#allocation2]  }
   0x4   :  { %s39_s10 = sshll.u32 %s875_s30, 4  ;;  %s27_s12 = sshll.u32 %s876_s11, 4  ;;  %s40_s10 = int_to_ptr.vmem [resolvable:$true] %s39_s10  ;;  %s28_s12 = int_to_ptr.vmem [resolvable:$true] %s27_s12 }
   0x5   :  { %s775_s13 = scalar_lea.vmem %s40_s10, 512  ;;  %p780_p1 = scmp.lt.s32.totalorder %s40_s10, %s40_s10 }
   0x6   :  { %p776_p0 = scmp.ne.s32.totalorder %s40_s10, %s775_s13  ;;  %p781_p2 = scmp.lt.s32.totalorder %s775_s13, %s775_s13 }
   0x8   :  { %p782_p3 = por %p781_p2, %p780_p1 }
   0xa   :  { %p783_p4 = pnand %p782_p3, %p776_p0 }
   0xc   :  { %786 = shalt.err (!%p783_p4)
}
   0xd   :  { %s877_s14 = smov 256   ;;  %s878_s15 = smov 16  }
   0xe   :  { %45 = dma.hbm_to_vmem [thread:$0]  %s1009_s3, 512, %s40_s10, [#allocation6], %s877_s14, %s877_s14, %s878_s15  }
   0xf   :  { %s795_s18 = scalar_lea.vmem %s28_s12, 1536  ;;  %p800_p6 = scmp.lt.s32.totalorder %s28_s12, %s28_s12 }
  0x10   :  { %p796_p5 = scmp.ne.s32.totalorder %s28_s12, %s795_s18  ;;  %p801_p7 = scmp.lt.s32.totalorder %s795_s18, %s795_s18 }
  0x12   :  { %p802_p8 = por %p801_p7, %p800_p6 }
  0x14   :  { %p803_p9 = pnand %p802_p8, %p796_p5 }
  0x16   :  { %806 = shalt.err (!%p803_p9)
}
  0x17   :  { %33 = dma.hbm_to_vmem [thread:$0]  %s1008_s2, 1536, %s28_s12, [#allocation3], %s877_s14, %s877_s14, %s878_s15  }
  0x18   :  { %s879_s21 = smov [#allocation7]   ;;  %s880_s23 = smov [#allocation8]  }
  0x19   :  { %s53_s22 = sshll.u32 %s879_s21, 4  ;;  %s67_s24 = sshll.u32 %s880_s23, 4  ;;  %s54_s22 = int_to_ptr.vmem [resolvable:$true] %s53_s22  ;;  %s68_s24 = int_to_ptr.vmem [resolvable:$true] %s67_s24 }
  0x1a   :  { %s815_s25 = scalar_lea.vmem %s54_s22, 8192  ;;  %p820_p11 = scmp.lt.s32.totalorder %s54_s22, %s54_s22 }
  0x1b   :  { %p816_p10 = scmp.ne.s32.totalorder %s54_s22, %s815_s25  ;;  %p821_p12 = scmp.lt.s32.totalorder %s815_s25, %s815_s25 }
  0x1d   :  { %p822_p13 = por %p821_p12, %p820_p11 }
  0x1f   :  { %p823_p0 = pnand %p822_p13, %p816_p10 }
  0x21   :  { %826 = shalt.err (!%p823_p0)
}
  0x22   :  { %59 = dma.hbm_to_vmem [thread:$0]  %s1011_s5, 8192, %s54_s22, [#allocation6], %s877_s14, %s877_s14, %s878_s15  }
  0x23   :  { %s835_s27 = scalar_lea.vmem %s68_s24, 4096  ;;  %p840_p2 = scmp.lt.s32.totalorder %s68_s24, %s68_s24 }
  0x24   :  { %p836_p1 = scmp.ne.s32.totalorder %s68_s24, %s835_s27  ;;  %p841_p3 = scmp.lt.s32.totalorder %s835_s27, %s835_s27 }
  0x26   :  { %p842_p4 = por %p841_p3, %p840_p2 }
  0x28   :  { %p843_p5 = pnand %p842_p4, %p836_p1 }
  0x2a   :  { %846 = shalt.err (!%p843_p5)
}
  0x2b   :  { %s881_s2 = smov 128   ;;  %s882_s28 = smov 8  }
  0x2c   :  { %73 = dma.hbm_to_vmem [thread:$0]  %s1013_s7, 4096, %s68_s24, [#allocation9], %s881_s2, %s881_s2, %s882_s28  }
  0x2d   :  { %867 = dma.done.wait [#allocation3], 1536  }
  0x2e   :  { %868 = vsyncadd [#allocation3], 4294965760 }
  0x2f   :  { %869 = dma.done.wait [#allocation6], 8704  }
  0x30   :  { %870 = vsyncadd [#allocation6], 4294958592 }
  0x31   :  { %871 = dma.done.wait [#allocation9], 4096  }
  0x32   :  { %872 = vsyncadd [#allocation9], 4294963200  ;;  %v883_v0 = vmov 0.0   ;;  %v884_v1 = vmov 0   ;;  %v885_v2 = vmov 1   ;;  %v313_v3 = vld [vmem:[#allocation2 + $0x58] sm:$0xff] }
  0x33   :  { %382 = vmatprep.mubr.f32.mxu0 %v883_v0  ;;  %735 = vset.pattern.permute.xlu0 %v884_v1  ;;  %v312_v4 = vld [vmem:[#allocation2 + $0x50] sm:$0xff]  ;;  %v311_v5 = vld [vmem:[#allocation2 + $0x48] sm:$0xff]  ;;  %v310_v6 = vld [vmem:[#allocation2 + $0x40] sm:$0xff]  ;;  %vm314_vm4 = vcmask 392192   ;;  %v886_v33 = vmov 2  }
  0x34   :  { %746 = vset.pattern.permute.xlu1 %v885_v2  ;;  %338 = vmatprep.subr.mxu0 %v313_v3  ;;  %v309_v7 = vld [vmem:[#allocation2 + $0x38] sm:$0xff]  ;;  %v308_v8 = vld [vmem:[#allocation2 + $0x30] sm:$0xff]  ;;  %v307_v9 = vld [vmem:[#allocation2 + $0x28] sm:$0xff] }
  0x35   :  { %339 = vmatpush1.msra.mxu0 %v312_v4  ;;  %v306_v10 = vld [vmem:[#allocation2 + $0x20] sm:$0xff]  ;;  %v436_v12 = vld [vmem:[#allocation7 + $0xf8] sm:$0xff]  ;;  %v435_v13 = vld [vmem:[#allocation7 + $0xf0] sm:$0xff] }
  0x36   :  { %340 = vmatprep.subr.mxu0 %v311_v5  ;;  %v89_v11 = vld [vmem:[%s1007_s1] sm:$0xff]  ;;  %481 = vmatprep.subr.mxu1 %v436_v12  ;;  %v434_v14 = vld [vmem:[#allocation7 + $0xe8] sm:$0xff]  ;;  %v305_v15 = vld [vmem:[#allocation2 + $0x18] sm:$0xff] }
  0x37   :  { %341 = vmatpush1.msra.mxu0 %v310_v6  ;;  %vm94_vm0 = vcmp.eq.s32.totalorder %v89_v11, 0  ;;  %vm114_vm1 = vcmp.eq.s32.totalorder %v89_v11, 1  ;;  %vm134_vm2 = vcmp.eq.s32.totalorder %v89_v11, 2  ;;  %vm154_vm3 = vcmp.eq.s32.totalorder %v89_v11, 3  ;;  %482 = vmatpush1.msra.mxu1 %v435_v13  ;;  %v304_v20 = vld [vmem:[#allocation2 + $0x10] sm:$0xff]  ;;  %v303_v22 = vld [vmem:[#allocation2 + $0x8] sm:$0xff] }
  0x38   :  { %342 = vmatprep.subr.mxu0 %v309_v7  ;;  %v681_v16 = vsel %vm94_vm0, 1.0, %v883_v0  ;;  %v682_v17 = vsel %vm114_vm1, 1.0, %v883_v0  ;;  %v683_v18 = vsel %vm134_vm2, 1.0, %v883_v0  ;;  %v684_v19 = vsel %vm154_vm3, 1.0, %v883_v0  ;;  %483 = vmatprep.subr.mxu1 %v434_v14  ;;  %v433_v23 = vld [vmem:[#allocation7 + $0xe0] sm:$0xff]  ;;  %v432_v26 = vld [vmem:[#allocation7 + $0xd8] sm:$0xff] }
  0x39   :  { %343 = vmatpush1.msra.mxu0 %v308_v8  ;;  %v736_v21 = vpack.i.bf16 %v682_v17, %v681_v16  ;;  %v302_v24 = vld [vmem:[#allocation2] sm:$0xff]  ;;  %v741_v25 = vpack.i.bf16 %v684_v19, %v683_v18  ;;  %484 = vmatpush1.msra.mxu1 %v433_v23  ;;  %v431_v28 = vld [vmem:[#allocation7 + $0xd0] sm:$0xff]  ;;  %v430_v29 = vld [vmem:[#allocation7 + $0xc8] sm:$0xff] }
  0x3a   :  { %344 = vmatprep.subr.mxu0 %v307_v9  ;;  %v88_v27 = vld [vmem:[%s1006_s0] sm:$0xff]  ;;  %485 = vmatprep.subr.mxu1 %v432_v26  ;;  %v428_v31 = vld [vmem:[#allocation7 + $0xb8] sm:$0xff]  ;;  %v427_v32 = vld [vmem:[#allocation7 + $0xb0] sm:$0xff] }
  0x3b   :  { %345 = vmatpush1.msra.mxu0 %v306_v10  ;;  %737 = vperm.xlu0 %735, %v736_v21   ;;  %v429_v30 = vld [vmem:[#allocation7 + $0xc0] sm:$0xff]  ;;  %v426_v34 = vld [vmem:[#allocation7 + $0xa8] sm:$0xff]  ;;  %v424_v36 = vld [vmem:[#allocation7 + $0x98] sm:$0xff] }
  0x3c   :  { %346 = vmatprep.subr.mxu0 %v305_v15  ;;  %748 = vperm.xlu1 %746, %v736_v21   ;;  %v425_v35 = vld [vmem:[#allocation7 + $0xa0] sm:$0xff]  ;;  %v423_v37 = vld [vmem:[#allocation7 + $0x90] sm:$0xff]  ;;  %v422_v38 = vld [vmem:[#allocation7 + $0x88] sm:$0xff] }
  0x3d   :  { %347 = vmatpush1.msra.mxu0 %v304_v20  ;;  %486 = vmatpush1.msra.mxu1 %v431_v28  ;;  %v421_v39 = vld [vmem:[#allocation7 + $0x80] sm:$0xff]  ;;  %v420_v40 = vld [vmem:[#allocation7 + $0x78] sm:$0xff]  ;;  %v419_v41 = vld [vmem:[#allocation7 + $0x70] sm:$0xff] }
  0x3e   :  { %348 = vmatprep.subr.mxu0 %v303_v22  ;;  %487 = vmatprep.subr.mxu1 %v430_v29  ;;  %v418_v42 = vld [vmem:[#allocation7 + $0x68] sm:$0xff]  ;;  %v417_v43 = vld [vmem:[#allocation7 + $0x60] sm:$0xff]  ;;  %v416_v44 = vld [vmem:[#allocation7 + $0x58] sm:$0xff] }
  0x3f   :  { %349 = vmatpush1.msra.mxu0 %v302_v24  ;;  %742 = vperm.xlu0 %735, %v741_v25   ;;  %v415_v45 = vld [vmem:[#allocation7 + $0x50] sm:$0xff]  ;;  %v414_v46 = vld [vmem:[#allocation7 + $0x48] sm:$0xff]  ;;  %v413_v47 = vld [vmem:[#allocation7 + $0x40] sm:$0xff] }
  0x40   :  { %685 = vmatmul.mubr.msk.f32.vlgmr.msra.gmra.mxu0 %vm314_vm4, %v88_v27  ;;  %753 = vperm.xlu1 %746, %v741_v25   ;;  %v412_v48 = vld [vmem:[#allocation7 + $0x38] sm:$0xff]  ;;  %v411_v49 = vld [vmem:[#allocation7 + $0x30] sm:$0xff]  ;;  %v410_v50 = vld [vmem:[#allocation7 + $0x28] sm:$0xff] }
  0x41   :  { %488 = vmatpush1.msra.mxu1 %v429_v30  ;;  %v409_v51 = vld [vmem:[#allocation7 + $0x20] sm:$0xff]  ;;  %v408_v52 = vld [vmem:[#allocation7 + $0x18] sm:$0xff]  ;;  %v407_v53 = vld [vmem:[#allocation7 + $0x10] sm:$0xff] }
  0x42   :  { %489 = vmatprep.subr.mxu1 %v428_v31  ;;  %v406_v54 = vld [vmem:[#allocation7 + $0x8] sm:$0xff]  ;;  %v405_v55 = vld [vmem:[#allocation7] sm:$0xff]  ;;  %v468_v56 = vld [vmem:[#allocation7 + $0x1f8] sm:$0xff] }
  0x43   :  { %757 = vset.pattern.permute.xlu0 %v886_v33  ;;  %490 = vmatpush1.msra.mxu1 %v427_v32  ;;  %v467_v57 = vld [vmem:[#allocation7 + $0x1f0] sm:$0xff]  ;;  %v466_v58 = vld [vmem:[#allocation7 + $0x1e8] sm:$0xff]  ;;  %v465_v59 = vld [vmem:[#allocation7 + $0x1e0] sm:$0xff] }
  0x44   :  { %758 = vset.pattern.permute.xlu1 %v886_v33  ;;  %239 = vperm.xlu0 %757, %v681_v16   ;;  %v464_v60 = vld [vmem:[#allocation7 + $0x1d8] sm:$0xff]  ;;  %v463_v61 = vld [vmem:[#allocation7 + $0x1d0] sm:$0xff]  ;;  %v462_v62 = vld [vmem:[#allocation7 + $0x1c8] sm:$0xff] }
  0x45   :  { %255 = vperm.xlu1 %758, %v682_v17   ;;  %491 = vmatprep.subr.mxu1 %v426_v34  ;;  %v461_v63 = vld [vmem:[#allocation7 + $0x1c0] sm:$0xff]  ;;  %v460_v0 = vld [vmem:[#allocation7 + $0x1b8] sm:$0xff]  ;;  %v459_v1 = vld [vmem:[#allocation7 + $0x1b0] sm:$0xff] }
  0x46   :  { %492 = vmatpush1.msra.mxu1 %v425_v35  ;;  %v458_v2 = vld [vmem:[#allocation7 + $0x1a8] sm:$0xff]  ;;  %v457_v3 = vld [vmem:[#allocation7 + $0x1a0] sm:$0xff]  ;;  %v456_v4 = vld [vmem:[#allocation7 + $0x198] sm:$0xff] }
  0x47   :  { %493 = vmatprep.subr.mxu1 %v424_v36  ;;  %v455_v5 = vld [vmem:[#allocation7 + $0x190] sm:$0xff]  ;;  %v454_v6 = vld [vmem:[#allocation7 + $0x188] sm:$0xff]  ;;  %v453_v7 = vld [vmem:[#allocation7 + $0x180] sm:$0xff]  ;;  %v102_v36 = vlaneseq }
  0x48   :  { %287 = vperm.xlu0 %757, %v684_v19   ;;  %494 = vmatpush1.msra.mxu1 %v423_v37  ;;  %v452_v8 = vld [vmem:[#allocation7 + $0x178] sm:$0xff]  ;;  %v451_v9 = vld [vmem:[#allocation7 + $0x170] sm:$0xff]  ;;  %v450_v10 = vld [vmem:[#allocation7 + $0x168] sm:$0xff] }
  0x49   :  { %271 = vperm.xlu1 %758, %v683_v18   ;;  %495 = vmatprep.subr.mxu1 %v422_v38  ;;  %v449_v11 = vld [vmem:[#allocation7 + $0x160] sm:$0xff]  ;;  %v448_v12 = vld [vmem:[#allocation7 + $0x158] sm:$0xff]  ;;  %v447_v13 = vld [vmem:[#allocation7 + $0x150] sm:$0xff]  ;;  %v956_v37 = vshrl.u32 %v102_v36, 7 }
  0x4a   :  { %496 = vmatpush1.msra.mxu1 %v421_v39  ;;  %v446_v14 = vld [vmem:[#allocation7 + $0x148] sm:$0xff]  ;;  %v445_v15 = vld [vmem:[#allocation7 + $0x140] sm:$0xff]  ;;  %v444_v16 = vld [vmem:[#allocation7 + $0x138] sm:$0xff] }
  0x4b   :  { %497 = vmatprep.subr.mxu1 %v420_v40  ;;  %v443_v17 = vld [vmem:[#allocation7 + $0x130] sm:$0xff]  ;;  %v442_v18 = vld [vmem:[#allocation7 + $0x128] sm:$0xff]  ;;  %v441_v19 = vld [vmem:[#allocation7 + $0x120] sm:$0xff]  ;;  %v959_v39 = vsub.s32 0, %v956_v37  ;;  %v962_v40 = vsub.s32 1, %v956_v37 }
  0x4c   :  { %498 = vmatpush1.msra.mxu1 %v419_v41  ;;  %v440_v20 = vld [vmem:[#allocation7 + $0x118] sm:$0xff]  ;;  %v439_v21 = vld [vmem:[#allocation7 + $0x110] sm:$0xff]  ;;  %v438_v22 = vld [vmem:[#allocation7 + $0x108] sm:$0xff] }
  0x4d   :  { %499 = vmatprep.subr.mxu1 %v418_v42  ;;  %v437_v23 = vld [vmem:[#allocation7 + $0x100] sm:$0xff]  ;;  %v585_v24 = vld [vmem:[#allocation8 + $0xf8] sm:$0xff]  ;;  %v584_v26 = vld [vmem:[#allocation8 + $0xf0] sm:$0xff] }
  0x4e   :  { %500 = vmatpush1.msra.mxu1 %v417_v43  ;;  %v569_v25 = vld [vmem:[#allocation8 + $0x78] sm:$0xff]  ;;  %687 = vmatprep.subr.mxu0 %v585_v24  ;;  %v568_v27 = vld [vmem:[#allocation8 + $0x70] sm:$0xff]  ;;  %v583_v28 = vld [vmem:[#allocation8 + $0xe8] sm:$0xff]  ;;  %v965_v43 = vsub.s32 2, %v956_v37 }
  0x4f   :  { %501 = vmatprep.subr.mxu1 %v416_v44  ;;  %688 = vmatpush3.msra.mxu0 %v569_v25  ;;  %v567_v29 = vld [vmem:[#allocation8 + $0x68] sm:$0xff]  ;;  %v582_v30 = vld [vmem:[#allocation8 + $0xe0] sm:$0xff]  ;;  %v581_v32 = vld [vmem:[#allocation8 + $0xd8] sm:$0xff] }
  0x50   :  { %502 = vmatpush1.msra.mxu1 %v415_v45  ;;  %689 = vmatprep.subr.mxu0 %v584_v26  ;;  %v566_v31 = vld [vmem:[#allocation8 + $0x60] sm:$0xff]  ;;  %v565_v33 = vld [vmem:[#allocation8 + $0x58] sm:$0xff]  ;;  %v580_v34 = vld [vmem:[#allocation8 + $0xd0] sm:$0xff] }
  0x51   :  { %503 = vmatprep.subr.mxu1 %v414_v46  ;;  %690 = vmatpush3.msra.mxu0 %v568_v27  ;;  %v564_v35 = vld [vmem:[#allocation8 + $0x50] sm:$0xff]  ;;  %v90_v41 = vld [vmem:[#allocation5] sm:$0xff]  ;;  %v91_v42 = vld [vmem:[#allocation5 + $0x8] sm:$0xff] }
  0x52   :  { %504 = vmatpush1.msra.mxu1 %v413_v47  ;;  %691 = vmatprep.subr.mxu0 %v583_v28  ;;  %v105_v44 = vrot.slane %v90_v41, %v959_v39  ;;  %v125_v45 = vrot.slane %v90_v41, %v962_v40 }
  0x53   :  { %505 = vmatprep.subr.mxu1 %v412_v48  ;;  %692 = vmatpush3.msra.mxu0 %v567_v29 }
  0x54   :  { %506 = vmatpush1.msra.mxu1 %v411_v49  ;;  %693 = vmatprep.subr.mxu0 %v582_v30  ;;  %v109_v49 = vrot.slane %v91_v42, %v959_v39 }
  0x55   :  { %507 = vmatprep.subr.mxu1 %v410_v50  ;;  %694 = vmatpush3.msra.mxu0 %v566_v31  ;;  %v129_v50 = vrot.slane %v91_v42, %v962_v40 }
  0x56   :  { %508 = vmatpush1.msra.mxu1 %v409_v51  ;;  %695 = vmatprep.subr.mxu0 %v581_v32  ;;  %v972_v51 = vsub.s32 3, %v956_v37 }
  0x57   :  { %509 = vmatprep.subr.mxu1 %v408_v52  ;;  %696 = vmatpush3.msra.mxu0 %v565_v33  ;;  %v92_v33 = vld [vmem:[#allocation5 + $0x10] sm:$0xf] }
  0x58   :  { %510 = vmatpush1.msra.mxu1 %v407_v53  ;;  %697 = vmatprep.subr.mxu0 %v580_v34 }
  0x59   :  { %511 = vmatprep.subr.mxu1 %v406_v54  ;;  %698 = vmatpush3.msra.mxu0 %v564_v35  ;;  %v145_v54 = vrot.slane %v90_v41, %v965_v43 }
  0x5a   :  { %512 = vmatpush1.msra.mxu1 %v405_v55 }
  0x5b   :  { %513 = vmatprep.subr.mxu1 %v468_v56 }
  0x5c   :  { %514 = vmatpush2.msra.mxu1 %v467_v57 }
  0x5d   :  { %515 = vmatprep.subr.mxu1 %v466_v58  ;;  %v149_v58 = vrot.slane %v91_v42, %v965_v43 }
  0x5e   :  { %516 = vmatpush2.msra.mxu1 %v465_v59  ;;  %v165_v59 = vrot.slane %v90_v41, %v972_v51 }
  0x5f   :  { %517 = vmatprep.subr.mxu1 %v464_v60 }
  0x60   :  { %518 = vmatpush2.msra.mxu1 %v463_v61 }
  0x61   :  { %519 = vmatprep.subr.mxu1 %v462_v62 }
  0x62   :  { %520 = vmatpush2.msra.mxu1 %v461_v63  ;;  %v180_v63 = vsub.s32 4, %v956_v37 }
  0x63   :  { %521 = vmatprep.subr.mxu1 %v460_v0 }
  0x64   :  { %522 = vmatpush2.msra.mxu1 %v459_v1 }
  0x65   :  { %523 = vmatprep.subr.mxu1 %v458_v2  ;;  %v169_v2 = vrot.slane %v91_v42, %v972_v51 }
  0x66   :  { %524 = vmatpush2.msra.mxu1 %v457_v3 }
  0x67   :  { %525 = vmatprep.subr.mxu1 %v456_v4  ;;  %v196_v4 = vsub.s32 5, %v956_v37 }
  0x68   :  { %526 = vmatpush2.msra.mxu1 %v455_v5 }
  0x69   :  { %527 = vmatprep.subr.mxu1 %v454_v6 }
  0x6a   :  { %528 = vmatpush2.msra.mxu1 %v453_v7  ;;  %v181_v7 = vrot.slane %v90_v41, %v180_v63 }
  0x6b   :  { %529 = vmatprep.subr.mxu1 %v452_v8 }
  0x6c   :  { %530 = vmatpush2.msra.mxu1 %v451_v9 }
  0x6d   :  { %531 = vmatprep.subr.mxu1 %v450_v10 }
  0x6e   :  { %532 = vmatpush2.msra.mxu1 %v449_v11  ;;  %v185_v11 = vrot.slane %v91_v42, %v180_v63 }
  0x6f   :  { %533 = vmatprep.subr.mxu1 %v448_v12  ;;  %v197_v12 = vrot.slane %v90_v41, %v196_v4 }
  0x70   :  { %534 = vmatpush2.msra.mxu1 %v447_v13 }
  0x71   :  { %535 = vmatprep.subr.mxu1 %v446_v14 }
  0x72   :  { %536 = vmatpush2.msra.mxu1 %v445_v15 }
  0x73   :  { %537 = vmatprep.subr.mxu1 %v444_v16  ;;  %v212_v16 = vsub.s32 6, %v956_v37 }
  0x74   :  { %538 = vmatpush2.msra.mxu1 %v443_v17 }
  0x75   :  { %539 = vmatprep.subr.mxu1 %v442_v18  ;;  %v213_v24 = vrot.slane %v90_v41, %v212_v16  ;;  %v217_v28 = vrot.slane %v91_v42, %v212_v16 }
  0x76   :  { %540 = vmatpush2.msra.mxu1 %v441_v19  ;;  %v201_v19 = vrot.slane %v91_v42, %v196_v4 }
  0x77   :  { %541 = vmatprep.subr.mxu1 %v440_v20 }
  0x78   :  { %542 = vmatpush2.msra.mxu1 %v439_v21  ;;  %v228_v21 = vsub.s32 7, %v956_v37  ;;  %v245_v37 = vrot.slane %v92_v33, %v959_v39 }
  0x79   :  { %543 = vmatprep.subr.mxu1 %v438_v22 }
  0x7a   :  { %544 = vmatpush2.msra.mxu1 %v437_v23  ;;  %v229_v30 = vrot.slane %v90_v41, %v228_v21  ;;  %v233_v35 = vrot.slane %v91_v42, %v228_v21  ;;  %v579_v21 = vld [vmem:[#allocation8 + $0xc8] sm:$0xff] }
  0x7b   :  { %699 = vmatprep.subr.mxu0 %v579_v21 }
  0xb6   :  { %v738_v38 = vpop.permute.xlu0 %737 }
  0xb7   :  { %v740_v46 = vunpack.i.h.bf16 %v738_v38  ;;  %v739_v47 = vunpack.i.l.bf16 %v738_v38  ;;  %v749_v0 = vpop.permute.xlu1 %748  ;;  %v93_v38 = vld [vmem:[#allocation5 + $0x18] sm:$0xf] }
  0xb8   :  { %v750_v8 = vunpack.i.l.bf16 %v749_v0  ;;  %v751_v14 = vunpack.i.h.bf16 %v749_v0 }
  0xb9   :  { %v130_v52 = vmul.f32 %v740_v46, %v125_v45  ;;  %v110_v53 = vmul.f32 %v739_v47, %v105_v44  ;;  %v131_v56 = vmul.f32 %v740_v46, %v129_v50  ;;  %v111_v57 = vmul.f32 %v739_v47, %v109_v49 }
  0xba   :  { %v743_v48 = vpop.permute.xlu0 %742  ;;  %v186_v15 = vmul.f32 %v750_v8, %v181_v7  ;;  %v187_v20 = vmul.f32 %v750_v8, %v185_v11  ;;  %v202_v22 = vmul.f32 %v751_v14, %v197_v12  ;;  %v203_v26 = vmul.f32 %v751_v14, %v201_v19 }
  0xbb   :  { %v744_v55 = vunpack.i.l.bf16 %v743_v48  ;;  %v132_v60 = vadd.f32 %v130_v52, %v110_v53  ;;  %v745_v61 = vunpack.i.h.bf16 %v743_v48  ;;  %v133_v1 = vadd.f32 %v131_v56, %v111_v57  ;;  %v754_v17 = vpop.permute.xlu1 %753 }
  0xbc   :  { %v755_v25 = vunpack.i.l.bf16 %v754_v17  ;;  %v756_v31 = vunpack.i.h.bf16 %v754_v17  ;;  %v249_v49 = vrot.slane %v93_v38, %v959_v39  ;;  %v261_v52 = vrot.slane %v92_v33, %v962_v40 }
  0xbd   :  { %v150_v62 = vmul.f32 %v744_v55, %v145_v54  ;;  %v151_v3 = vmul.f32 %v744_v55, %v149_v58  ;;  %v170_v5 = vmul.f32 %v745_v61, %v165_v59  ;;  %v171_v9 = vmul.f32 %v745_v61, %v169_v2 }
  0xbe   :  { %v218_v32 = vmul.f32 %v755_v25, %v213_v24  ;;  %v219_v36 = vmul.f32 %v755_v25, %v217_v28  ;;  %v234_v44 = vmul.f32 %v756_v31, %v229_v30  ;;  %v235_v47 = vmul.f32 %v756_v31, %v233_v35  ;;  %v562_v24 = vld [vmem:[#allocation8 + $0x40] sm:$0xff]  ;;  %v577_v25 = vld [vmem:[#allocation8 + $0xb8] sm:$0xff]  ;;  %v560_v28 = vld [vmem:[#allocation8 + $0x30] sm:$0xff] }
  0xbf   :  { %v152_v6 = vadd.f32 %v150_v62, %v132_v60  ;;  %v153_v10 = vadd.f32 %v151_v3, %v133_v1  ;;  %v240_v46 = vpop.permute.xlu0 %239  ;;  %v265_v54 = vrot.slane %v93_v38, %v962_v40  ;;  %v277_v58 = vrot.slane %v92_v33, %v965_v43  ;;  %v559_v30 = vld [vmem:[#allocation8 + $0x28] sm:$0xff]  ;;  %v574_v31 = vld [vmem:[#allocation8 + $0xa0] sm:$0xff]  ;;  %v572_v35 = vld [vmem:[#allocation8 + $0x90] sm:$0xff] }
  0xc0   :  { %v256_v50 = vpop.permute.xlu1 %255  ;;  %v250_v53 = vmul.f32 %v245_v37, %v240_v46  ;;  %v251_v42 = vmul.f32 %v249_v49, %v240_v46  ;;  %v281_v62 = vrot.slane %v93_v38, %v965_v43  ;;  %v293_v1 = vrot.slane %v92_v33, %v972_v51  ;;  %v573_v33 = vld [vmem:[#allocation8 + $0x98] sm:$0xff]  ;;  %v554_v37 = vld [vmem:[#allocation8] sm:$0xff] }
  0xc1   :  { %v172_v13 = vadd.f32 %v170_v5, %v152_v6  ;;  %v173_v18 = vadd.f32 %v171_v9, %v153_v10  ;;  %v266_v56 = vmul.f32 %v261_v52, %v256_v50  ;;  %v267_v60 = vmul.f32 %v265_v54, %v256_v50  ;;  %v389_v10 = vld [vmem:[%s1010_s4] sm:$0x3] }
  0xc2   :  { %v297_v5 = vrot.slane %v93_v38, %v972_v51  ;;  %v394_v43 = vrot.slane %v389_v10, %v959_v39  ;;  %v571_v38 = vld [vmem:[#allocation8 + $0x88] sm:$0xff]  ;;  %v469_v46 = vld [vmem:[%s1012_s6] sm:$0x3]  ;;  %s887_s6 = smov [#allocation10]  }
  0xc3   :  { %v188_v23 = vadd.f32 %v186_v15, %v172_v13  ;;  %v189_v27 = vadd.f32 %v187_v20, %v173_v18  ;;  %v288_v2 = vpop.permute.xlu0 %287  ;;  %v398_v15 = vrot.slane %v389_v10, %v962_v40  ;;  %s670_s15 = sshll.u32 %s887_s6, 4  ;;  %s671_s15 = int_to_ptr.vmem [resolvable:$true] %s670_s15 }
  0xc4   :  { %v272_v59 = vpop.permute.xlu1 %271  ;;  %v298_v7 = vmul.f32 %v293_v1, %v288_v2  ;;  %v299_v9 = vmul.f32 %v297_v5, %v288_v2  ;;  %s847_s16 = scalar_lea.vmem %s671_s15, 128  ;;  %p852_p7 = scmp.lt.s32.totalorder %s671_s15, %s671_s15 }
  0xc5   :  { %v204_v29 = vadd.f32 %v202_v22, %v188_v23  ;;  %v205_v34 = vadd.f32 %v203_v26, %v189_v27  ;;  %v282_v0 = vmul.f32 %v277_v58, %v272_v59  ;;  %v283_v4 = vmul.f32 %v281_v62, %v272_v59  ;;  %v563_v22 = vld [vmem:[#allocation8 + $0x48] sm:$0xff]  ;;  %v578_v23 = vld [vmem:[#allocation8 + $0xc0] sm:$0xff]  ;;  %v561_v26 = vld [vmem:[#allocation8 + $0x38] sm:$0xff]  ;;  %p848_p6 = scmp.ne.s32.totalorder %s671_s15, %s847_s16  ;;  %p853_p8 = scmp.lt.s32.totalorder %s847_s16, %s847_s16 }
  0xc6   :  { %700 = vmatpush3.msra.mxu0 %v563_v22  ;;  %v576_v27 = vld [vmem:[#allocation8 + $0xb0] sm:$0xff] }
  0xc7   :  { %v220_v45 = vadd.f32 %v218_v32, %v204_v29  ;;  %v221_v48 = vadd.f32 %v219_v36, %v205_v34  ;;  %701 = vmatprep.subr.mxu0 %v578_v23  ;;  %v575_v29 = vld [vmem:[#allocation8 + $0xa8] sm:$0xff]  ;;  %v558_v32 = vld [vmem:[#allocation8 + $0x20] sm:$0xff]  ;;  %v557_v34 = vld [vmem:[#allocation8 + $0x18] sm:$0xff]  ;;  %p854_p9 = por %p853_p8, %p852_p7 }
  0xc8   :  { %702 = vmatpush3.msra.mxu0 %v562_v24  ;;  %v556_v36 = vld [vmem:[#allocation8 + $0x10] sm:$0xff] }
  0xc9   :  { %v236_v41 = vadd.f32 %v234_v44, %v220_v45  ;;  %v237_v55 = vadd.f32 %v235_v47, %v221_v48  ;;  %703 = vmatprep.subr.mxu0 %v577_v25  ;;  %v555_v44 = vld [vmem:[#allocation8 + $0x8] sm:$0xff]  ;;  %v570_v45 = vld [vmem:[#allocation8 + $0x80] sm:$0xff]  ;;  %v474_v47 = vrot.slane %v469_v46, %v959_v39  ;;  %v478_v48 = vrot.slane %v469_v46, %v962_v40  ;;  %p855_p10 = pnand %p854_p9, %p848_p6 }
  0xca   :  { %704 = vmatpush3.msra.mxu0 %v561_v26 }
  0xcb   :  { %v252_v57 = vadd.f32 %v250_v53, %v236_v41  ;;  %v253_v61 = vadd.f32 %v251_v42, %v237_v55  ;;  %705 = vmatprep.subr.mxu0 %v576_v27  ;;  %v686_v42 = vld [vmem:[%s1014_s8] ss:$0 sm:$0xff] }
  0xcc   :  { %706 = vmatpush3.msra.mxu0 %v560_v28 }
  0xcd   :  { %v268_v63 = vadd.f32 %v266_v56, %v252_v57  ;;  %v269_v3 = vadd.f32 %v267_v60, %v253_v61  ;;  %707 = vmatprep.subr.mxu0 %v575_v29 }
  0xce   :  { %708 = vmatpush3.msra.mxu0 %v559_v30 }
  0xcf   :  { %v284_v6 = vadd.f32 %v282_v0, %v268_v63  ;;  %v285_v8 = vadd.f32 %v283_v4, %v269_v3  ;;  %709 = vmatprep.subr.mxu0 %v574_v31 }
  0xd0   :  { %710 = vmatpush3.msra.mxu0 %v558_v32 }
  0xd1   :  { %v300_v11 = vadd.f32 %v298_v7, %v284_v6  ;;  %v301_v14 = vadd.f32 %v299_v9, %v285_v8  ;;  %711 = vmatprep.subr.mxu0 %v573_v33 }
  0xd2   :  { %712 = vmatpush3.msra.mxu0 %v557_v34 }
  0xd3   :  { %713 = vmatprep.subr.mxu0 %v572_v35 }
  0xd4   :  { %714 = vmatpush3.msra.mxu0 %v556_v36 }
  0xd5   :  { %715 = vmatprep.subr.mxu0 %v571_v38 }
  0xd6   :  { %716 = vmatpush3.msra.mxu0 %v555_v44 }
  0xd7   :  { %717 = vmatprep.subr.mxu0 %v570_v45 }
  0xd8   :  { %718 = vmatpush3.msra.mxu0 %v554_v37 }
 0x100   :  { %v384_v12 = vpop.f32.mrf.mxu0 }
 0x101   :  { %v385_v13 = vadd.f32 %v384_v12, %v300_v11 }
 0x102   :  { %v386_v16 = vpop.f32.mrf.mxu0 }
 0x103   :  { %v387_v17 = vadd.f32 %v386_v16, %v301_v14  ;;  %v401_v18 = vadd.f32 %v394_v43, %v385_v13 }
 0x105   :  { %v402_v51 = vadd.f32 %v398_v15, %v387_v17 }
 0x107   :  { %759 = vtanh.f32 %v402_v51 }
 0x108   :  { %761 = vtanh.f32 %v401_v18 }
 0x114   :  { %v760_v19 = vpop.eup %759 }
 0x115   :  { %v762_v20 = vpop.eup %761  ;;  %545 = vmatprep.mubr.f32.mxu1 %v760_v19 }
 0x116   :  { %546 = vmatmul.mubr.f32.vlgmr.msra.gmra.mxu1 %v762_v20 }
 0x1d6   :  { %v547_v49 = vpop.f32.mrf.mxu1 }
 0x1d7   :  { %v548_v50 = vadd.f32 %v547_v49, %v474_v47 }
 0x1d8   :  { %v549_v52 = vpop.f32.mrf.mxu1 }
 0x1d9   :  { %v550_v41 = vadd.f32 %v549_v52, %v478_v48 }
 0x1db   :  { %763 = vtanh.f32 %v550_v41 }
 0x1dc   :  { %765 = vtanh.f32 %v548_v50 }
 0x1e8   :  { %v764_v53 = vpop.eup %763 }
 0x1e9   :  { %v766_v54 = vpop.eup %765  ;;  %657 = vmatprep.mubr.f32.mxu0 %v764_v53 }
 0x1ea   :  { %658 = vmatmul.mubr.f32.vlgmr.msra.gmra.mxu0 %v766_v54 }
 0x2aa   :  { %v719_v55 = vpop.f32.mrf.mxu0 }
 0x2ac   :  { %v720_v56 = vpop.f32.mrf.mxu0 }
 0x2ad   :  { %v721_v39 = vadd.f32 %v720_v56, %v719_v55 }
 0x2af   :  { %v660_v40 = vadd.f32 %v721_v39, %v686_v42 }
 0x2b1   :  { %663 = vst [vmem:[#allocation10] sm:$0xff] %v660_v40 }
 0x2b2   :  { %858 = shalt.err (!%p855_p10)
}
 0x2b3   :  { %673 = dma.vmem_to_hbm [thread:$0]  %s671_s15, 128, %s1015_s9, [#allocation4]  }
 0x2b4   :  { %873 = dma.done.wait [#allocation4], 128  }
 0x2b5   :  { %874 = vsyncadd [#allocation4], 4294967168 }
 0x2b6   :  { %677 = vsyncpa [#allocation3], 1 }
 0x2b7   :  { %678 = vsyncpa [#allocation6], 1 }
 0x2b8   :  { %679 = vsyncpa [#allocation9], 1 }
 0x2b9   :  { %680 = vsyncpa [#allocation4], 1 }

</bundles_post_ra>
